<compile_context>
chip_gen: v6e
topology: v6e:2x2x1
jax: 0.10.0
libtpu: 0.0.40
codegen_flags: <defaults>
</compile_context>

<pallas_src>
import functools

import jax
import jax.numpy as jnp
import numpy as np
from jax.experimental import pallas as pl
from jax.experimental.pallas import tpu as pltpu


def _round_up(x, m):
    return (x + m - 1) // m * m


def _bias_layout(H, H2, lat_pad, rna_pad, met_pad):
    """Static, lane(128)-aligned layout of the packed bias vector."""
    segs = [
        ("re1", H), ("re2", H2),            # rnaseq encoder
        ("me1", H), ("me2", H2),            # metag encoder
        ("lat", lat_pad),                   # fused mu||logvar head (padded)
        ("d1", H),                          # fused decoder layer-1 (rna||met)
        ("rd2", H), ("rd3", rna_pad),       # rnaseq decoder
        ("md2", H), ("md3", met_pad),       # metag decoder
    ]
    layout, off = {}, 0
    for name, width in segs:
        layout[name] = off
        off += _round_up(width, 128)        # keep every segment lane-aligned
    return layout, off


# ----------------------------------------------------------------------------
# Pallas kernel: fused MultiOmicsVAE forward (one batch tile per grid step)
# ----------------------------------------------------------------------------
def _vae_kernel(
    rna_ref, met_ref, eps_ref, bias_ref,
    reW1, reW2, meW1, meW2, Wlr, Wlm, Wd1, rdW2z, rd3W, mdW2z, md3W,
    rna_out, met_out, mulv_out,
):
    f32 = jnp.float32
    bf16 = jnp.bfloat16
    H, H2 = reW2.shape
    L = Wd1.shape[0]
    lat_pad = Wlr.shape[1]
    rna_pad = rna_out.shape[1]
    met_pad = met_out.shape[1]
    off, _ = _bias_layout(H, H2, lat_pad, rna_pad, met_pad)

    def bias(name, width):
        o = off[name]                       # static, 128-aligned
        return bias_ref[:, o:o + width]

    def dot(x, w_ref):
        # bf16 MXU operands (weights stored bf16), f32 accumulation.
        # Bias-add / ReLU / exp epilogue stays f32 (no bf16 VPU/EUP on v5e).
        return jnp.dot(x.astype(bf16), w_ref[...], preferred_element_type=f32)

    def relu(x):
        return jnp.maximum(x, 0.0)

    rna = rna_ref[...].astype(f32)
    met = met_ref[...].astype(f32)

    # ---- encoders (BN folded into W/b; Dropout = identity in eval) ----
    rh = relu(dot(rna, reW1) + bias("re1", H))
    rh = relu(dot(rh, reW2) + bias("re2", H2))
    mh = relu(dot(met, meW1) + bias("me1", H))
    mh = relu(dot(mh, meW2) + bias("me2", H2))

    # ---- latent heads: concat-free (two accumulating dots), mu||logvar fused
    # and zero-column padded to lat_pad lanes (lane-dense store).
    mulv = dot(rh, Wlr) + dot(mh, Wlm) + bias("lat", lat_pad)   # [TB, lat_pad]
    mu = mulv[:, :L]
    logvar = mulv[:, L:2 * L]
    z = mu + eps_ref[:, :L].astype(f32) * jnp.exp(0.5 * logvar)

    # ---- decoders: layer-1 fused on the shared z; layer-2 weights are
    # zero-row padded so the fused h1 ([rna | met] columns) is consumed
    # directly, without cross-lane slicing.
    h1 = relu(dot(z, Wd1) + bias("d1", H))                      # [TB, H]
    r2 = relu(dot(h1, rdW2z) + bias("rd2", H))                  # [TB, H]
    m2 = relu(dot(h1, mdW2z) + bias("md2", H))                  # [TB, H]

    rna_out[...] = (dot(r2, rd3W) + bias("rd3", rna_pad)).astype(rna_out.dtype)
    met_out[...] = (dot(m2, md3W) + bias("md3", met_pad)).astype(met_out.dtype)
    mulv_out[...] = mulv.astype(mulv_out.dtype)


# ----------------------------------------------------------------------------
# Parameter construction (torch-like, deterministic, synthetic)
# ----------------------------------------------------------------------------
def _linear(key, din, dout):
    kw, kb = jax.random.split(key)
    bound = 1.0 / float(np.sqrt(din))
    return {
        "W": jax.random.uniform(kw, (din, dout), jnp.float32, -bound, bound),
        "b": jax.random.uniform(kb, (dout,), jnp.float32, -bound, bound),
    }


def _bn(key, dim):
    kg, kb, km, kv = jax.random.split(key, 4)
    return {
        "gamma": 1.0 + 0.1 * jax.random.normal(kg, (dim,), jnp.float32),
        "beta": 0.1 * jax.random.normal(kb, (dim,), jnp.float32),
        "mean": 0.1 * jax.random.normal(km, (dim,), jnp.float32),
        "var": 1.0 + 0.1 * jax.random.uniform(kv, (dim,), jnp.float32),
    }


def make_torch_like_params(key, rnaseq_dim, metag_dim, hidden_dim=128, latent_dim=32):
    H, H2, L = hidden_dim, hidden_dim // 2, latent_dim
    keys = iter(jax.random.split(key, 32))
    p = {}
    # encoders
    p["re1"], p["re1_bn"] = _linear(next(keys), rnaseq_dim, H), _bn(next(keys), H)
    p["re2"], p["re2_bn"] = _linear(next(keys), H, H2), _bn(next(keys), H2)
    p["me1"], p["me1_bn"] = _linear(next(keys), metag_dim, H), _bn(next(keys), H)
    p["me2"], p["me2_bn"] = _linear(next(keys), H, H2), _bn(next(keys), H2)
    # latent heads
    p["mu"] = _linear(next(keys), H, L)
    p["lv"] = _linear(next(keys), H, L)
    # decoders
    p["rd1"], p["rd1_bn"] = _linear(next(keys), L, H2), _bn(next(keys), H2)
    p["rd2"], p["rd2_bn"] = _linear(next(keys), H2, H), _bn(next(keys), H)
    p["rd3"] = _linear(next(keys), H, rnaseq_dim)
    p["md1"], p["md1_bn"] = _linear(next(keys), L, H2), _bn(next(keys), H2)
    p["md2"], p["md2_bn"] = _linear(next(keys), H2, H), _bn(next(keys), H)
    p["md3"] = _linear(next(keys), H, metag_dim)
    return p


# ----------------------------------------------------------------------------
# Host-side folding / fusion / packing of parameters for the kernel
# ----------------------------------------------------------------------------
def _fold_linear_bn(lin, bn, eps=1e-5):
    scale = bn["gamma"] / jnp.sqrt(bn["var"] + eps)      # per-output-column
    shift = bn["beta"] - bn["mean"] * scale
    return lin["W"] * scale[None, :], lin["b"] * scale + shift


def pack_params(p, rnaseq_dim, metag_dim, hidden_dim, latent_dim):
    H, H2, L = hidden_dim, hidden_dim // 2, latent_dim
    rna_in_pad = _round_up(rnaseq_dim, 128)
    met_in_pad = _round_up(metag_dim, 128)
    rna_pad = _round_up(rnaseq_dim, 128)
    met_pad = _round_up(metag_dim, 128)
    lat_pad = _round_up(2 * L, 128)
    f32, bf16 = jnp.float32, jnp.bfloat16

    reW1, reb1 = _fold_linear_bn(p["re1"], p["re1_bn"])
    reW2, reb2 = _fold_linear_bn(p["re2"], p["re2_bn"])
    meW1, meb1 = _fold_linear_bn(p["me1"], p["me1_bn"])
    meW2, meb2 = _fold_linear_bn(p["me2"], p["me2_bn"])

    # pad encoder layer-1 contraction dim (rows) with zeros; wrapper pads the
    # matching input columns with zeros -> exact.
    reW1 = jnp.pad(reW1, ((0, rna_in_pad - rnaseq_dim), (0, 0)))
    meW1 = jnp.pad(meW1, ((0, met_in_pad - metag_dim), (0, 0)))

    # latent: concat-free (row halves) + mu||logvar column fusion, zero-column
    # padded to a 128-lane multiple (lane-dense mulv output)
    Wmu, bmu = p["mu"]["W"], p["mu"]["b"]
    Wlv, blv = p["lv"]["W"], p["lv"]["b"]
    Wlr = jnp.concatenate([Wmu[:H2], Wlv[:H2]], axis=1)          # [H2, 2L]
    Wlm = jnp.concatenate([Wmu[H2:], Wlv[H2:]], axis=1)          # [H2, 2L]
    Wlr = jnp.pad(Wlr, ((0, 0), (0, lat_pad - 2 * L)))
    Wlm = jnp.pad(Wlm, ((0, 0), (0, lat_pad - 2 * L)))
    blat = jnp.pad(jnp.concatenate([bmu, blv]), (0, lat_pad - 2 * L))

    rd1W, rd1b = _fold_linear_bn(p["rd1"], p["rd1_bn"])
    rd2W, rd2b = _fold_linear_bn(p["rd2"], p["rd2_bn"])
    md1W, md1b = _fold_linear_bn(p["md1"], p["md1_bn"])
    md2W, md2b = _fold_linear_bn(p["md2"], p["md2_bn"])

    # decoder layer-1 fused on shared z
    Wd1 = jnp.concatenate([rd1W, md1W], axis=1)                  # [L, H]
    bd1 = jnp.concatenate([rd1b, md1b])                          # [H]
    # decoder layer-2: zero-row padding selects the right half of fused h1
    rdW2z = jnp.concatenate([rd2W, jnp.zeros((H2, H), f32)], axis=0)   # [H, H]
    mdW2z = jnp.concatenate([jnp.zeros((H2, H), f32), md2W], axis=0)   # [H, H]
    # decoder layer-3: pad output dim to a lane multiple for dense stores
    rd3W = jnp.pad(p["rd3"]["W"], ((0, 0), (0, rna_pad - rnaseq_dim)))
    rd3b = jnp.pad(p["rd3"]["b"], (0, rna_pad - rnaseq_dim))
    md3W = jnp.pad(p["md3"]["W"], ((0, 0), (0, met_pad - metag_dim)))
    md3b = jnp.pad(p["md3"]["b"], (0, met_pad - metag_dim))

    # store all matmul weights as bf16 (halves HBM->VMEM traffic + VMEM)
    weights = tuple(w.astype(bf16) for w in (
        reW1, reW2, meW1, meW2, Wlr, Wlm, Wd1, rdW2z, rd3W, mdW2z, md3W))

    layout, total = _bias_layout(H, H2, lat_pad, rna_pad, met_pad)
    bias = jnp.zeros((1, total), f32)

    def put(buf, name, vec):
        o = layout[name]
        return buf.at[0, o:o + vec.shape[0]].set(vec.astype(f32))

    for name, vec in [("re1", reb1), ("re2", reb2), ("me1", meb1), ("me2", meb2),
                      ("lat", blat), ("d1", bd1), ("rd2", rd2b), ("rd3", rd3b),
                      ("md2", md2b), ("md3", md3b)]:
        bias = put(bias, name, vec)

    return weights, bias


# ----------------------------------------------------------------------------
# Wrapper around pallas_call
# ----------------------------------------------------------------------------
@functools.partial(jax.jit, static_argnames=("batch_tile",))
def multiomics_vae_forward(rnaseq, metag, eps, weights, bias, batch_tile=None):
    """Eval-mode forward ONLY (running-stat BN folded on host, Dropout=identity)."""
    (reW1, reW2, meW1, meW2, Wlr, Wlm, Wd1, rdW2z, rd3W, mdW2z, md3W) = weights
    B, rna_dim = rnaseq.shape
    met_dim = metag.shape[1]
    H, H2 = reW2.shape
    L = Wd1.shape[0]
    lat_pad = Wlr.shape[1]
    rna_in_pad = reW1.shape[0]
    met_in_pad = meW1.shape[0]
    rna_pad = rd3W.shape[1]
    met_pad = md3W.shape[1]
    eps_pad = _round_up(L, 128)
    _, total = _bias_layout(H, H2, lat_pad, rna_pad, met_pad)
    assert bias.shape == (1, total)
    assert eps.shape[1] == L

    # batch tiling: pad to a multiple of the tile (>= 8 f32 sublanes)
    if batch_tile is not None:
        TB = batch_tile
    else:
        Bp8 = _round_up(B, 8)
        TB = min(256, Bp8)              # 256 rows feed the v6e/v7x 256x256 MXU
        if TB == Bp8 and Bp8 >= 16:     # keep >= 2 grid steps (v7x megacore)
            TB = _round_up(Bp8 // 2, 8)
    Bp = _round_up(B, TB)

    # zero-pad batch rows and input feature columns (lane-dense input DMAs)
    rnaseq = jnp.pad(rnaseq, ((0, Bp - B), (0, rna_in_pad - rna_dim)))
    metag = jnp.pad(metag, ((0, Bp - B), (0, met_in_pad - met_dim)))
    eps = jnp.pad(eps, ((0, Bp - B), (0, eps_pad - L)))

    grid = (Bp // TB,)

    def row_spec(cols):
        return pl.BlockSpec((TB, cols), lambda b: (b, 0))

    def weight_spec(shape):
        # Grid-invariant operand: single-buffer to halve resident weight VMEM.
        idx = lambda b: (0,) * len(shape)
        try:
            return pl.BlockSpec(shape, idx, pipeline_mode=pl.Buffered(1))
        except TypeError:   # BlockSpec without pipeline_mode support
            return pl.BlockSpec(shape, idx)

    in_specs = [
        row_spec(rna_in_pad),           # rnaseq
        row_spec(met_in_pad),           # metag
        row_spec(eps_pad),              # eps
        weight_spec((1, total)),        # packed biases (single small DMA)
    ] + [weight_spec(tuple(w.shape)) for w in weights]

    out_specs = (
        row_spec(rna_pad),
        row_spec(met_pad),
        row_spec(lat_pad),
    )
    out_shape = (
        jax.ShapeDtypeStruct((Bp, rna_pad), jnp.float32),
        jax.ShapeDtypeStruct((Bp, met_pad), jnp.float32),
        jax.ShapeDtypeStruct((Bp, lat_pad), jnp.float32),
    )

    # explicit VMEM budget: single-buffered weights + double-buffered I/O tiles
    # + activation slack; capped at 56 MiB so it is also safe on v7x (64 MiB).
    weight_bytes = sum(int(np.prod(w.shape)) * w.dtype.itemsize for w in weights)
    weight_bytes += int(bias.size) * 4
    io_bytes = 2 * TB * (rna_in_pad + met_in_pad + eps_pad) * 4
    io_bytes += 2 * TB * (rna_pad + met_pad + lat_pad) * 4
    act_bytes = TB * (6 * H + 2 * H2 + lat_pad) * 4
    need = weight_bytes + io_bytes + act_bytes + (4 << 20)
    vmem_limit = int(min(max(need, 16 << 20), 56 << 20))

    rna_rec_p, met_rec_p, mulv = pl.pallas_call(
        _vae_kernel,
        out_shape=out_shape,
        grid=grid,
        in_specs=in_specs,
        out_specs=out_specs,
        compiler_params=pltpu.CompilerParams(
            dimension_semantics=("parallel",),   # megacore split on v7x
            vmem_limit_bytes=vmem_limit,
        ),
    )(rnaseq, metag, eps, bias, *weights)

    rna_rec = rna_rec_p[:B, :rna_dim]
    met_rec = met_rec_p[:B, :met_dim]
    mu = mulv[:B, :L]
    logvar = mulv[:B, L:2 * L]
    return rna_rec, met_rec, mu, logvar


# ----------------------------------------------------------------------------
# Pure-JAX reference on the UNFOLDED torch-like params (eval-mode semantics)
# ----------------------------------------------------------------------------
def _reference_forward(rnaseq, metag, eps, p, bn_eps=1e-5):
    def lin(x, l):
        return x @ l["W"] + l["b"]

    def bn(x, b):
        return (x - b["mean"]) / jnp.sqrt(b["var"] + bn_eps) * b["gamma"] + b["beta"]

    def block(x, l, b):
        return jnp.maximum(bn(lin(x, l), b), 0.0)

    rh = block(rnaseq, p["re1"], p["re1_bn"])
    rh = block(rh, p["re2"], p["re2_bn"])
    mh = block(metag, p["me1"], p["me1_bn"])
    mh = block(mh, p["me2"], p["me2_bn"])
    c = jnp.concatenate([rh, mh], axis=1)
    mu = lin(c, p["mu"])
    lv = lin(c, p["lv"])
    z = mu + eps * jnp.exp(0.5 * lv)
    r = block(z, p["rd1"], p["rd1_bn"])
    r = block(r, p["rd2"], p["rd2_bn"])
    rr = lin(r, p["rd3"])
    m = block(z, p["md1"], p["md1_bn"])
    m = block(m, p["md2"], p["md2_bn"])
    mr = lin(m, p["md3"])
    return rr, mr, mu, lv


# ----------------------------------------------------------------------------
if __name__ == "__main__":
    B = 12                 # non-multiple of the batch tile -> exercises padding
    RNASEQ_DIM = 64
    METAG_DIM = 48
    HIDDEN_DIM = 32
    LATENT_DIM = 8
    BATCH_TILE = 8         # grid=(2,) over batch; "parallel" on v7x megacore

    key = jax.random.PRNGKey(0)
    k_rna, k_met, k_eps, k_par = jax.random.split(key, 4)

    rnaseq = jax.random.normal(k_rna, (B, RNASEQ_DIM), jnp.float32)
    metag = jax.random.normal(k_met, (B, METAG_DIM), jnp.float32)
    eps = jax.random.normal(k_eps, (B, LATENT_DIM), jnp.float32)

    torch_like = make_torch_like_params(k_par, RNASEQ_DIM, METAG_DIM, HIDDEN_DIM, LATENT_DIM)
    weights, bias = pack_params(torch_like, RNASEQ_DIM, METAG_DIM, HIDDEN_DIM, LATENT_DIM)

    outs = multiomics_vae_forward(rnaseq, metag, eps, weights, bias, batch_tile=BATCH_TILE)
    outs = jax.block_until_ready(outs)

    refs = _reference_forward(rnaseq, metag, eps, torch_like)
    # bf16 MXU operands (f32 accumulation + f32 epilogue) vs. f32 reference
    # -> loosened tolerance per the performance-review correctness note.
    for o, r in zip(outs, refs):
        np.testing.assert_allclose(np.asarray(o), np.asarray(r), rtol=5e-2, atol=5e-2)

    print("KERNEL_OK")
</pallas_src>

<mosaic_0001>
module attributes {stable_mosaic.version = 11 : i64} {
  func.func @_vae_kernel(%arg0: i32, %arg1: memref<8x128xf32, #tpu.memory_space<vmem>>, %arg2: memref<8x128xf32, #tpu.memory_space<vmem>>, %arg3: memref<8x128xf32, #tpu.memory_space<vmem>>, %arg4: memref<1x1280xf32, #tpu.memory_space<vmem>>, %arg5: memref<128x32xbf16, #tpu.memory_space<vmem>>, %arg6: memref<32x16xbf16, #tpu.memory_space<vmem>>, %arg7: memref<128x32xbf16, #tpu.memory_space<vmem>>, %arg8: memref<32x16xbf16, #tpu.memory_space<vmem>>, %arg9: memref<16x128xbf16, #tpu.memory_space<vmem>>, %arg10: memref<16x128xbf16, #tpu.memory_space<vmem>>, %arg11: memref<8x32xbf16, #tpu.memory_space<vmem>>, %arg12: memref<32x32xbf16, #tpu.memory_space<vmem>>, %arg13: memref<32x128xbf16, #tpu.memory_space<vmem>>, %arg14: memref<32x32xbf16, #tpu.memory_space<vmem>>, %arg15: memref<32x128xbf16, #tpu.memory_space<vmem>>, %arg16: memref<8x128xf32, #tpu.memory_space<vmem>>, %arg17: memref<8x128xf32, #tpu.memory_space<vmem>>, %arg18: memref<8x128xf32, #tpu.memory_space<vmem>>) attributes {dimension_semantics = [#tpu.dimension_semantics<parallel>], iteration_bounds = array<i64: 2>, scalar_prefetch = 0 : i64, scratch_operands = 0 : i64, tpu.core_type = #tpu.core_type<tc>, window_params = [{transform_indices = @transform_0, window_bounds = array<i64: 8, 128>}, {transform_indices = @transform_1, window_bounds = array<i64: 8, 128>}, {transform_indices = @transform_2, window_bounds = array<i64: 8, 128>}, {pipeline_mode = #tpu.pipeline_mode<synchronous>, transform_indices = @transform_3, window_bounds = array<i64: 1, 1280>}, {pipeline_mode = #tpu.pipeline_mode<synchronous>, transform_indices = @transform_4, window_bounds = array<i64: 128, 32>}, {pipeline_mode = #tpu.pipeline_mode<synchronous>, transform_indices = @transform_5, window_bounds = array<i64: 32, 16>}, {pipeline_mode = #tpu.pipeline_mode<synchronous>, transform_indices = @transform_6, window_bounds = array<i64: 128, 32>}, {pipeline_mode = #tpu.pipeline_mode<synchronous>, transform_indices = @transform_7, window_bounds = array<i64: 32, 16>}, {pipeline_mode = #tpu.pipeline_mode<synchronous>, transform_indices = @transform_8, window_bounds = array<i64: 16, 128>}, {pipeline_mode = #tpu.pipeline_mode<synchronous>, transform_indices = @transform_9, window_bounds = array<i64: 16, 128>}, {pipeline_mode = #tpu.pipeline_mode<synchronous>, transform_indices = @transform_10, window_bounds = array<i64: 8, 32>}, {pipeline_mode = #tpu.pipeline_mode<synchronous>, transform_indices = @transform_11, window_bounds = array<i64: 32, 32>}, {pipeline_mode = #tpu.pipeline_mode<synchronous>, transform_indices = @transform_12, window_bounds = array<i64: 32, 128>}, {pipeline_mode = #tpu.pipeline_mode<synchronous>, transform_indices = @transform_13, window_bounds = array<i64: 32, 32>}, {pipeline_mode = #tpu.pipeline_mode<synchronous>, transform_indices = @transform_14, window_bounds = array<i64: 32, 128>}, {transform_indices = @transform_15, window_bounds = array<i64: 8, 128>}, {transform_indices = @transform_16, window_bounds = array<i64: 8, 128>}, {transform_indices = @transform_17, window_bounds = array<i64: 8, 128>}]} {
    %c0 = arith.constant 0 : index
    %c0_0 = arith.constant 0 : index
    %0 = vector.load %arg1[%c0, %c0_0] : memref<8x128xf32, #tpu.memory_space<vmem>>, vector<8x128xf32>
    %c0_1 = arith.constant 0 : index
    %c0_2 = arith.constant 0 : index
    %1 = vector.load %arg2[%c0_1, %c0_2] : memref<8x128xf32, #tpu.memory_space<vmem>>, vector<8x128xf32>
    %2 = arith.truncf %0 : vector<8x128xf32> to vector<8x128xbf16>
    %c0_3 = arith.constant 0 : index
    %c0_4 = arith.constant 0 : index
    %3 = vector.load %arg5[%c0_3, %c0_4] : memref<128x32xbf16, #tpu.memory_space<vmem>>, vector<128x32xbf16>
    %cst = arith.constant dense<0.000000e+00> : vector<8x32xf32>
    %4 = tpu.matmul %2, %3, %cst {dimension_numbers = #tpu.dot_dimension_numbers<[1], [0], [0], [1], [0, 0, 1, 1], [], []>} : vector<8x128xbf16>, vector<128x32xbf16>, vector<8x32xf32> -> vector<8x32xf32>
    %c0_5 = arith.constant 0 : index
    %c0_6 = arith.constant 0 : index
    %5 = vector.load %arg4[%c0_5, %c0_6] : memref<1x1280xf32, #tpu.memory_space<vmem>>, vector<1x32xf32>
    %6 = vector.broadcast %5 : vector<1x32xf32> to vector<8x32xf32>
    %7 = arith.addf %4, %6 : vector<8x32xf32>
    %cst_7 = arith.constant 0.000000e+00 : f32
    %8 = vector.broadcast %cst_7 : f32 to vector<8x32xf32>
    %9 = arith.maximumf %7, %8 : vector<8x32xf32>
    %10 = arith.truncf %9 : vector<8x32xf32> to vector<8x32xbf16>
    %c0_8 = arith.constant 0 : index
    %c0_9 = arith.constant 0 : index
    %11 = vector.load %arg6[%c0_8, %c0_9] : memref<32x16xbf16, #tpu.memory_space<vmem>>, vector<32x16xbf16>
    %cst_10 = arith.constant dense<0.000000e+00> : vector<8x16xf32>
    %12 = tpu.matmul %10, %11, %cst_10 {dimension_numbers = #tpu.dot_dimension_numbers<[1], [0], [0], [1], [0, 0, 1, 1], [], []>} : vector<8x32xbf16>, vector<32x16xbf16>, vector<8x16xf32> -> vector<8x16xf32>
    %c0_11 = arith.constant 0 : index
    %c128 = arith.constant 128 : index
    %13 = vector.load %arg4[%c0_11, %c128] : memref<1x1280xf32, #tpu.memory_space<vmem>>, vector<1x16xf32>
    %14 = vector.broadcast %13 : vector<1x16xf32> to vector<8x16xf32>
    %15 = arith.addf %12, %14 : vector<8x16xf32>
    %cst_12 = arith.constant 0.000000e+00 : f32
    %16 = vector.broadcast %cst_12 : f32 to vector<8x16xf32>
    %17 = arith.maximumf %15, %16 : vector<8x16xf32>
    %18 = arith.truncf %1 : vector<8x128xf32> to vector<8x128xbf16>
    %c0_13 = arith.constant 0 : index
    %c0_14 = arith.constant 0 : index
    %19 = vector.load %arg7[%c0_13, %c0_14] : memref<128x32xbf16, #tpu.memory_space<vmem>>, vector<128x32xbf16>
    %cst_15 = arith.constant dense<0.000000e+00> : vector<8x32xf32>
    %20 = tpu.matmul %18, %19, %cst_15 {dimension_numbers = #tpu.dot_dimension_numbers<[1], [0], [0], [1], [0, 0, 1, 1], [], []>} : vector<8x128xbf16>, vector<128x32xbf16>, vector<8x32xf32> -> vector<8x32xf32>
    %c0_16 = arith.constant 0 : index
    %c256 = arith.constant 256 : index
    %21 = vector.load %arg4[%c0_16, %c256] : memref<1x1280xf32, #tpu.memory_space<vmem>>, vector<1x32xf32>
    %22 = vector.broadcast %21 : vector<1x32xf32> to vector<8x32xf32>
    %23 = arith.addf %20, %22 : vector<8x32xf32>
    %cst_17 = arith.constant 0.000000e+00 : f32
    %24 = vector.broadcast %cst_17 : f32 to vector<8x32xf32>
    %25 = arith.maximumf %23, %24 : vector<8x32xf32>
    %26 = arith.truncf %25 : vector<8x32xf32> to vector<8x32xbf16>
    %c0_18 = arith.constant 0 : index
    %c0_19 = arith.constant 0 : index
    %27 = vector.load %arg8[%c0_18, %c0_19] : memref<32x16xbf16, #tpu.memory_space<vmem>>, vector<32x16xbf16>
    %cst_20 = arith.constant dense<0.000000e+00> : vector<8x16xf32>
    %28 = tpu.matmul %26, %27, %cst_20 {dimension_numbers = #tpu.dot_dimension_numbers<[1], [0], [0], [1], [0, 0, 1, 1], [], []>} : vector<8x32xbf16>, vector<32x16xbf16>, vector<8x16xf32> -> vector<8x16xf32>
    %c0_21 = arith.constant 0 : index
    %c384 = arith.constant 384 : index
    %29 = vector.load %arg4[%c0_21, %c384] : memref<1x1280xf32, #tpu.memory_space<vmem>>, vector<1x16xf32>
    %30 = vector.broadcast %29 : vector<1x16xf32> to vector<8x16xf32>
    %31 = arith.addf %28, %30 : vector<8x16xf32>
    %cst_22 = arith.constant 0.000000e+00 : f32
    %32 = vector.broadcast %cst_22 : f32 to vector<8x16xf32>
    %33 = arith.maximumf %31, %32 : vector<8x16xf32>
    %34 = arith.truncf %17 : vector<8x16xf32> to vector<8x16xbf16>
    %c0_23 = arith.constant 0 : index
    %c0_24 = arith.constant 0 : index
    %35 = vector.load %arg9[%c0_23, %c0_24] : memref<16x128xbf16, #tpu.memory_space<vmem>>, vector<16x128xbf16>
    %cst_25 = arith.constant dense<0.000000e+00> : vector<8x128xf32>
    %36 = tpu.matmul %34, %35, %cst_25 {dimension_numbers = #tpu.dot_dimension_numbers<[1], [0], [0], [1], [0, 0, 1, 1], [], []>} : vector<8x16xbf16>, vector<16x128xbf16>, vector<8x128xf32> -> vector<8x128xf32>
    %37 = arith.truncf %33 : vector<8x16xf32> to vector<8x16xbf16>
    %c0_26 = arith.constant 0 : index
    %c0_27 = arith.constant 0 : index
    %38 = vector.load %arg10[%c0_26, %c0_27] : memref<16x128xbf16, #tpu.memory_space<vmem>>, vector<16x128xbf16>
    %cst_28 = arith.constant dense<0.000000e+00> : vector<8x128xf32>
    %39 = tpu.matmul %37, %38, %cst_28 {dimension_numbers = #tpu.dot_dimension_numbers<[1], [0], [0], [1], [0, 0, 1, 1], [], []>} : vector<8x16xbf16>, vector<16x128xbf16>, vector<8x128xf32> -> vector<8x128xf32>
    %40 = arith.addf %36, %39 : vector<8x128xf32>
    %c0_29 = arith.constant 0 : index
    %c512 = arith.constant 512 : index
    %41 = vector.load %arg4[%c0_29, %c512] : memref<1x1280xf32, #tpu.memory_space<vmem>>, vector<1x128xf32>
    %42 = vector.broadcast %41 : vector<1x128xf32> to vector<8x128xf32>
    %43 = arith.addf %40, %42 : vector<8x128xf32>
    %44 = vector.extract_strided_slice %43 {offsets = [0, 0], sizes = [8, 8], strides = [1, 1]} : vector<8x128xf32> to vector<8x8xf32>
    %45 = vector.extract_strided_slice %43 {offsets = [0, 8], sizes = [8, 8], strides = [1, 1]} : vector<8x128xf32> to vector<8x8xf32>
    %c0_30 = arith.constant 0 : index
    %c0_31 = arith.constant 0 : index
    %46 = vector.load %arg3[%c0_30, %c0_31] : memref<8x128xf32, #tpu.memory_space<vmem>>, vector<8x8xf32>
    %cst_32 = arith.constant 5.000000e-01 : f32
    %47 = vector.broadcast %cst_32 : f32 to vector<8x8xf32>
    %48 = arith.mulf %47, %45 : vector<8x8xf32>
    %49 = math.exp %48 : vector<8x8xf32>
    %50 = arith.mulf %46, %49 : vector<8x8xf32>
    %51 = arith.addf %44, %50 : vector<8x8xf32>
    %52 = arith.truncf %51 : vector<8x8xf32> to vector<8x8xbf16>
    %c0_33 = arith.constant 0 : index
    %c0_34 = arith.constant 0 : index
    %53 = vector.load %arg11[%c0_33, %c0_34] : memref<8x32xbf16, #tpu.memory_space<vmem>>, vector<8x32xbf16>
    %cst_35 = arith.constant dense<0.000000e+00> : vector<8x32xf32>
    %54 = tpu.matmul %52, %53, %cst_35 {dimension_numbers = #tpu.dot_dimension_numbers<[1], [0], [0], [1], [0, 0, 1, 1], [], []>} : vector<8x8xbf16>, vector<8x32xbf16>, vector<8x32xf32> -> vector<8x32xf32>
    %c0_36 = arith.constant 0 : index
    %c640 = arith.constant 640 : index
    %55 = vector.load %arg4[%c0_36, %c640] : memref<1x1280xf32, #tpu.memory_space<vmem>>, vector<1x32xf32>
    %56 = vector.broadcast %55 : vector<1x32xf32> to vector<8x32xf32>
    %57 = arith.addf %54, %56 : vector<8x32xf32>
    %cst_37 = arith.constant 0.000000e+00 : f32
    %58 = vector.broadcast %cst_37 : f32 to vector<8x32xf32>
    %59 = arith.maximumf %57, %58 : vector<8x32xf32>
    %60 = arith.truncf %59 : vector<8x32xf32> to vector<8x32xbf16>
    %c0_38 = arith.constant 0 : index
    %c0_39 = arith.constant 0 : index
    %61 = vector.load %arg12[%c0_38, %c0_39] : memref<32x32xbf16, #tpu.memory_space<vmem>>, vector<32x32xbf16>
    %cst_40 = arith.constant dense<0.000000e+00> : vector<8x32xf32>
    %62 = tpu.matmul %60, %61, %cst_40 {dimension_numbers = #tpu.dot_dimension_numbers<[1], [0], [0], [1], [0, 0, 1, 1], [], []>} : vector<8x32xbf16>, vector<32x32xbf16>, vector<8x32xf32> -> vector<8x32xf32>
    %c0_41 = arith.constant 0 : index
    %c768 = arith.constant 768 : index
    %63 = vector.load %arg4[%c0_41, %c768] : memref<1x1280xf32, #tpu.memory_space<vmem>>, vector<1x32xf32>
    %64 = vector.broadcast %63 : vector<1x32xf32> to vector<8x32xf32>
    %65 = arith.addf %62, %64 : vector<8x32xf32>
    %cst_42 = arith.constant 0.000000e+00 : f32
    %66 = vector.broadcast %cst_42 : f32 to vector<8x32xf32>
    %67 = arith.maximumf %65, %66 : vector<8x32xf32>
    %68 = arith.truncf %59 : vector<8x32xf32> to vector<8x32xbf16>
    %c0_43 = arith.constant 0 : index
    %c0_44 = arith.constant 0 : index
    %69 = vector.load %arg14[%c0_43, %c0_44] : memref<32x32xbf16, #tpu.memory_space<vmem>>, vector<32x32xbf16>
    %cst_45 = arith.constant dense<0.000000e+00> : vector<8x32xf32>
    %70 = tpu.matmul %68, %69, %cst_45 {dimension_numbers = #tpu.dot_dimension_numbers<[1], [0], [0], [1], [0, 0, 1, 1], [], []>} : vector<8x32xbf16>, vector<32x32xbf16>, vector<8x32xf32> -> vector<8x32xf32>
    %c0_46 = arith.constant 0 : index
    %c1024 = arith.constant 1024 : index
    %71 = vector.load %arg4[%c0_46, %c1024] : memref<1x1280xf32, #tpu.memory_space<vmem>>, vector<1x32xf32>
    %72 = vector.broadcast %71 : vector<1x32xf32> to vector<8x32xf32>
    %73 = arith.addf %70, %72 : vector<8x32xf32>
    %cst_47 = arith.constant 0.000000e+00 : f32
    %74 = vector.broadcast %cst_47 : f32 to vector<8x32xf32>
    %75 = arith.maximumf %73, %74 : vector<8x32xf32>
    %76 = arith.truncf %67 : vector<8x32xf32> to vector<8x32xbf16>
    %c0_48 = arith.constant 0 : index
    %c0_49 = arith.constant 0 : index
    %77 = vector.load %arg13[%c0_48, %c0_49] : memref<32x128xbf16, #tpu.memory_space<vmem>>, vector<32x128xbf16>
    %cst_50 = arith.constant dense<0.000000e+00> : vector<8x128xf32>
    %78 = tpu.matmul %76, %77, %cst_50 {dimension_numbers = #tpu.dot_dimension_numbers<[1], [0], [0], [1], [0, 0, 1, 1], [], []>} : vector<8x32xbf16>, vector<32x128xbf16>, vector<8x128xf32> -> vector<8x128xf32>
    %c0_51 = arith.constant 0 : index
    %c896 = arith.constant 896 : index
    %79 = vector.load %arg4[%c0_51, %c896] : memref<1x1280xf32, #tpu.memory_space<vmem>>, vector<1x128xf32>
    %80 = vector.broadcast %79 : vector<1x128xf32> to vector<8x128xf32>
    %81 = arith.addf %78, %80 : vector<8x128xf32>
    %c0_52 = arith.constant 0 : index
    %c0_53 = arith.constant 0 : index
    %82 = vector.load %arg16[%c0_52, %c0_53] : memref<8x128xf32, #tpu.memory_space<vmem>>, vector<8x128xf32>
    tpu.vector_store %arg16[%c0_52, %c0_53], %81 {strides = array<i32>} : memref<8x128xf32, #tpu.memory_space<vmem>>, vector<8x128xf32>,
    %83 = arith.truncf %75 : vector<8x32xf32> to vector<8x32xbf16>
    %c0_54 = arith.constant 0 : index
    %c0_55 = arith.constant 0 : index
    %84 = vector.load %arg15[%c0_54, %c0_55] : memref<32x128xbf16, #tpu.memory_space<vmem>>, vector<32x128xbf16>
    %cst_56 = arith.constant dense<0.000000e+00> : vector<8x128xf32>
    %85 = tpu.matmul %83, %84, %cst_56 {dimension_numbers = #tpu.dot_dimension_numbers<[1], [0], [0], [1], [0, 0, 1, 1], [], []>} : vector<8x32xbf16>, vector<32x128xbf16>, vector<8x128xf32> -> vector<8x128xf32>
    %c0_57 = arith.constant 0 : index
    %c1152 = arith.constant 1152 : index
    %86 = vector.load %arg4[%c0_57, %c1152] : memref<1x1280xf32, #tpu.memory_space<vmem>>, vector<1x128xf32>
    %87 = vector.broadcast %86 : vector<1x128xf32> to vector<8x128xf32>
    %88 = arith.addf %85, %87 : vector<8x128xf32>
    %c0_58 = arith.constant 0 : index
    %c0_59 = arith.constant 0 : index
    %89 = vector.load %arg17[%c0_58, %c0_59] : memref<8x128xf32, #tpu.memory_space<vmem>>, vector<8x128xf32>
    tpu.vector_store %arg17[%c0_58, %c0_59], %88 {strides = array<i32>} : memref<8x128xf32, #tpu.memory_space<vmem>>, vector<8x128xf32>,
    %c0_60 = arith.constant 0 : index
    %c0_61 = arith.constant 0 : index
    %90 = vector.load %arg18[%c0_60, %c0_61] : memref<8x128xf32, #tpu.memory_space<vmem>>, vector<8x128xf32>
    tpu.vector_store %arg18[%c0_60, %c0_61], %43 {strides = array<i32>} : memref<8x128xf32, #tpu.memory_space<vmem>>, vector<8x128xf32>,
    return
  }
  func.func @transform_0(%arg0: i32) -> (i32, i32) {
    %c0_i32 = arith.constant 0 : i32
    %c0_i32_0 = arith.constant 0 : i32
    return %arg0, %c0_i32 : i32, i32
  }
  func.func @transform_1(%arg0: i32) -> (i32, i32) {
    %c0_i32 = arith.constant 0 : i32
    %c0_i32_0 = arith.constant 0 : i32
    return %arg0, %c0_i32 : i32, i32
  }
  func.func @transform_2(%arg0: i32) -> (i32, i32) {
    %c0_i32 = arith.constant 0 : i32
    %c0_i32_0 = arith.constant 0 : i32
    return %arg0, %c0_i32 : i32, i32
  }
  func.func @transform_3(%arg0: i32) -> (i32, i32) {
    %c0_i32 = arith.constant 0 : i32
    %c0_i32_0 = arith.constant 0 : i32
    %c0_i32_1 = arith.constant 0 : i32
    return %c0_i32, %c0_i32_0 : i32, i32
  }
  func.func @transform_4(%arg0: i32) -> (i32, i32) {
    %c0_i32 = arith.constant 0 : i32
    %c0_i32_0 = arith.constant 0 : i32
    %c0_i32_1 = arith.constant 0 : i32
    return %c0_i32, %c0_i32_0 : i32, i32
  }
  func.func @transform_5(%arg0: i32) -> (i32, i32) {
    %c0_i32 = arith.constant 0 : i32
    %c0_i32_0 = arith.constant 0 : i32
    %c0_i32_1 = arith.constant 0 : i32
    return %c0_i32, %c0_i32_0 : i32, i32
  }
  func.func @transform_6(%arg0: i32) -> (i32, i32) {
    %c0_i32 = arith.constant 0 : i32
    %c0_i32_0 = arith.constant 0 : i32
    %c0_i32_1 = arith.constant 0 : i32
    return %c0_i32, %c0_i32_0 : i32, i32
  }
  func.func @transform_7(%arg0: i32) -> (i32, i32) {
    %c0_i32 = arith.constant 0 : i32
    %c0_i32_0 = arith.constant 0 : i32
    %c0_i32_1 = arith.constant 0 : i32
    return %c0_i32, %c0_i32_0 : i32, i32
  }
  func.func @transform_8(%arg0: i32) -> (i32, i32) {
    %c0_i32 = arith.constant 0 : i32
    %c0_i32_0 = arith.constant 0 : i32
    %c0_i32_1 = arith.constant 0 : i32
    return %c0_i32, %c0_i32_0 : i32, i32
  }
  func.func @transform_9(%arg0: i32) -> (i32, i32) {
    %c0_i32 = arith.constant 0 : i32
    %c0_i32_0 = arith.constant 0 : i32
    %c0_i32_1 = arith.constant 0 : i32
    return %c0_i32, %c0_i32_0 : i32, i32
  }
  func.func @transform_10(%arg0: i32) -> (i32, i32) {
    %c0_i32 = arith.constant 0 : i32
    %c0_i32_0 = arith.constant 0 : i32
    %c0_i32_1 = arith.constant 0 : i32
    return %c0_i32, %c0_i32_0 : i32, i32
  }
  func.func @transform_11(%arg0: i32) -> (i32, i32) {
    %c0_i32 = arith.constant 0 : i32
    %c0_i32_0 = arith.constant 0 : i32
    %c0_i32_1 = arith.constant 0 : i32
    return %c0_i32, %c0_i32_0 : i32, i32
  }
  func.func @transform_12(%arg0: i32) -> (i32, i32) {
    %c0_i32 = arith.constant 0 : i32
    %c0_i32_0 = arith.constant 0 : i32
    %c0_i32_1 = arith.constant 0 : i32
    return %c0_i32, %c0_i32_0 : i32, i32
  }
  func.func @transform_13(%arg0: i32) -> (i32, i32) {
    %c0_i32 = arith.constant 0 : i32
    %c0_i32_0 = arith.constant 0 : i32
    %c0_i32_1 = arith.constant 0 : i32
    return %c0_i32, %c0_i32_0 : i32, i32
  }
  func.func @transform_14(%arg0: i32) -> (i32, i32) {
    %c0_i32 = arith.constant 0 : i32
    %c0_i32_0 = arith.constant 0 : i32
    %c0_i32_1 = arith.constant 0 : i32
    return %c0_i32, %c0_i32_0 : i32, i32
  }
  func.func @transform_15(%arg0: i32) -> (i32, i32) {
    %c0_i32 = arith.constant 0 : i32
    %c0_i32_0 = arith.constant 0 : i32
    return %arg0, %c0_i32 : i32, i32
  }
  func.func @transform_16(%arg0: i32) -> (i32, i32) {
    %c0_i32 = arith.constant 0 : i32
    %c0_i32_0 = arith.constant 0 : i32
    return %arg0, %c0_i32 : i32, i32
  }
  func.func @transform_17(%arg0: i32) -> (i32, i32) {
    %c0_i32 = arith.constant 0 : i32
    %c0_i32_0 = arith.constant 0 : i32
    return %arg0, %c0_i32 : i32, i32
  }
}

</mosaic_0001>

<bundles_post_ra>
// kernel: multiomics_vae_forward.1
= control target key start
LH: loop header
LB: loop body
LE: loop exit
PB: predicated region body
PF: predicated region fallthrough
CT: control target
= control target key end

     0   :  { %s2402_s0 = inlined_call_operand.vmem [shape: f32[16,128], index: 0, kind: input, shape index: {}]   ;;  %s2403_s1 = inlined_call_operand.vmem [shape: f32[16,128], index: 1, kind: input, shape index: {}]   ;;  %s2404_s2 = inlined_call_operand.vmem [shape: f32[16,128], index: 2, kind: input, shape index: {}]   ;;  %s2405_s3 = inlined_call_operand.vmem [shape: f32[1,1280], index: 3, kind: input, shape index: {}]   ;;  %s2406_s4 = inlined_call_operand.vmem [shape: bf16[128,32], index: 4, kind: input, shape index: {}]   ;;  %s2407_s5 = inlined_call_operand.vmem [shape: bf16[32,16], index: 5, kind: input, shape index: {}]   ;;  %s2408_s6 = inlined_call_operand.vmem [shape: bf16[128,32], index: 6, kind: input, shape index: {}]   ;;  %s2409_s7 = inlined_call_operand.vmem [shape: bf16[32,16], index: 7, kind: input, shape index: {}]   ;;  %s2410_s8 = inlined_call_operand.vmem [shape: bf16[16,128], index: 8, kind: input, shape index: {}]   ;;  %s2411_s9 = inlined_call_operand.vmem [shape: bf16[16,128], index: 9, kind: input, shape index: {}]   ;;  %s2412_s10 = inlined_call_operand.vmem [shape: bf16[8,32], index: 10, kind: input, shape index: {}]   ;;  %s2413_s11 = inlined_call_operand.vmem [shape: bf16[32,32], index: 11, kind: input, shape index: {}]   ;;  %s2414_s12 = inlined_call_operand.vmem [shape: bf16[32,128], index: 12, kind: input, shape index: {}]   ;;  %s2415_s13 = inlined_call_operand.vmem [shape: bf16[32,32], index: 13, kind: input, shape index: {}]   ;;  %s2416_s14 = inlined_call_operand.vmem [shape: bf16[32,128], index: 14, kind: input, shape index: {}]   ;;  %s2417_s15 = inlined_call_operand.hbm [shape: f32[16,128], index: 15, kind: output, shape index: {0}]   ;;  %s2418_s16 = inlined_call_operand.hbm [shape: f32[16,128], index: 16, kind: output, shape index: {1}]   ;;  %s2419_s17 = inlined_call_operand.vmem [shape: f32[16,128], index: 17, kind: output, shape index: {2}]  }
   0x1   :  { %2425 = sst [smem:[#allocation13_spill]] %s2402_s0 }
   0x2   :  { %2426 = sst [smem:[#allocation14_spill]] %s2403_s1 }
   0x3   :  { %2427 = sst [smem:[#allocation15_spill]] %s2404_s2 }
   0x4   :  { %2428 = sst [smem:[#allocation16_spill]] %s2405_s3 }
   0x5   :  { %2429 = sst [smem:[#allocation17_spill]] %s2406_s4 }
   0x6   :  { %23 = vsyncpa [#allocation3], 0 }
   0x7   :  { %25 = vsyncpa [#allocation3 + $0x1], 0 }
   0x8   :  { %26 = vsyncpa [#allocation5], 0 }
   0x9   :  { %28 = vsyncpa [#allocation5 + $0x1], 0  ;;  %s2072_s24 = smov 0   ;;  %s2074_s25 = smov 0  }
   0xa   :  { %s2076_s26 = smov 0   ;;  %s2078_s27 = smov 0  }
   0xb LB: > { %2430 = sst [smem:[#allocation8_spill]] %s1963_s24  ;;  %s2093_s28 = sadd.s32 4294967295, %s1975_s27   ;;  %s1975_s27 = sphi %s2078_s27, %s2444_s27   ;;  %s1971_s26 = sphi %s2076_s26, %s2446_s26   ;;  %s1967_s25 = sphi %s2074_s25, %s2448_s25   ;;  %s1963_s24 = sphi %s2072_s24, %s2447_s24  }
   0xc   : > { %2431 = sst [smem:[#allocation9_spill]] %s1971_s26  ;;  %s1593_s29 = sadd.s32 4294967294, %s1975_s27  }
   0xd   : > { %s2097_s0 = sadd.s32 1, %s1975_s27   ;;  %s371_s30 = sadd.s32 1, %s1971_s26 }
   0xe   : > { %2432 = sst [smem:[#allocation10_spill]] %s2097_s0  ;;  %s368_s18 = ssub.s32 %s1975_s27, %s2097_s0 }
   0xf   : > { %p381_p0 = scmp.ne.s32.totalorder %s1971_s26, %s1967_s25  ;;  %p369_p1 = scmp.eq.s32.totalorder %s368_s18, 0 }
  0x10   : > { %p382_p2 = scmp.eq.s32.totalorder %s2093_s28, 1  ;;  %p387_p3 = scmp.ne.s32.totalorder %s1967_s25, %s1963_s24 }
  0x11   : > { %p388_p4 = scmp.eq.s32.totalorder %s1593_s29, 1  ;;  %p1596_p7 = scmp.ge.s32.totalorder %s1975_s27, 1 }
  0x12   : > { %s2108_s19 = scalar_select %p369_p1, %s1971_s26, %s371_s30  }
  0x13   : > { %p2110_p5 = por %p382_p2, %p381_p0  ;;  %p2114_p6 = por %p388_p4, %p387_p3 }
  0x14   : > { %2433 = sst [smem:[#allocation11_spill]] %s2108_s19  ;;  %p515_p8 = scmp.lt.s32.totalorder %s1975_s27, 3 }
  0x15   : > { %s2435_s20 = scalar_select %p2114_p6, 1, 0 }
  0x16   : > { %p516_p9 = pnand %p1596_p7, %p515_p8 }
  0x17   : > { %2436 = sst [smem:[#allocation12_spill]] %s2435_s20  ;;  %p583_p10 = scmp.lt.s32.totalorder (!%p516_p9), %s2093_s28, 1 }
  0x18   : > { %519 = sbr.rel (%p516_p9) target bundleno = 1656 (0x678), region = 80  ;;  %s2437_s4 = sld [smem:[#allocation17_spill]] (!%p516_p9) }
  0x19   : > { %s2438_s23 = sld [smem:[#allocation13_spill]] (!%p516_p9)  ;;  %s1979_s22 = smov (!%p516_p9), 120  }
  0x1a   : > { %s2439_s3 = sld [smem:[#allocation16_spill]] (!%p516_p9) }
  0x1b   : > { %s2441_s2 = sld [smem:[#allocation15_spill]] (!%p516_p9) }
  0x1d   : > { %v1977_v1 = vmov 0.0   ;;  %vm1978_vm0 = vmmov 0   ;;  %s584_s30 = scalar_select %p583_p10, %s2093_s28, 1  ;;  %v1861_v5 = vld [vmem:[%s2407_s5 + $0x8] sm:$0xff]   ;;  %v1862_v12 = vld [vmem:[%s2407_s5] sm:$0xff]   ;;  %vm739_vm1 = vcmask 261120  }
  0x1e   : > { %v1853_v0 = vld [vmem:[%s2437_s4 + $0x38] sm:$0xff]   ;;  %1700 = vmatprep.subr.bf16.mxu0 %v1977_v1  ;;  %1720 = vmatprep.subr.bf16.mxu1 %v1977_v1  ;;  %v1854_v2 = vld [vmem:[%s2437_s4 + $0x30] sm:$0xff]   ;;  %v1855_v3 = vld [vmem:[%s2437_s4 + $0x28] sm:$0xff]   ;;  %vm977_vm2 = vcmask 130048   ;;  %vm1101_vm3 = vcmask 1043456   ;;  %vm1097_vm4 = vcmask 64512  }
  0x1f   : > { %1701 = vmatpush3.bf16.msra.mxu0 %v1853_v0  ;;  %1716 = vmatprep.mubr.msk.bf16.mxu0 %vm1978_vm0, %v1977_v1  ;;  %v1856_v4 = vld [vmem:[%s2437_s4 + $0x20] sm:$0xff]   ;;  %s2142_s29 = sshll.u32 %s584_s30, 3  ;;  %v1857_v6 = vld [vmem:[%s2437_s4 + $0x18] sm:$0xff]   ;;  %v1858_v7 = vld [vmem:[%s2437_s4 + $0x10] sm:$0xff]   ;;  %s2440_s30 = sld [smem:[#allocation14_spill]] }
  0x20   : > { %1702 = vmatprep.subr.bf16.mxu0 %v1977_v1  ;;  %1724 = vmatprep.mubr.msk.bf16.mxu1 %vm1978_vm0, %v1977_v1  ;;  %v1859_v8 = vld [vmem:[%s2437_s4 + $0x8] sm:$0xff]   ;;  %s586_s18 = scalar_lea.vmem %s2438_s23, %s2142_s29  ;;  %v1860_v9 = vld [vmem:[%s2437_s4] sm:$0xff]   ;;  %v1863_v19 = vld [vmem:[%s2408_s6 + $0x38] sm:$0xff]   ;;  %s598_s26 = scalar_lea.vmem %s2419_s17, %s2142_s29 }
  0x21   : > { %1721 = vmatpush3.bf16.msra.mxu1 %v1861_v5  ;;  %v600_v10 = vld [vmem:[%s586_s18] sm:$0xff]  ;;  %v1864_v22 = vld [vmem:[%s2408_s6 + $0x30] sm:$0xff]   ;;  %v1865_v23 = vld [vmem:[%s2408_s6 + $0x28] sm:$0xff]   ;;  %s2319_s18 = sand.u32 1, %s1967_s25  }
  0x22   : > { %1722 = vmatprep.subr.bf16.mxu1 %v1977_v1  ;;  %v602_v11 = vpack.c.bf16 %v600_v10, %v600_v10  ;;  %v1603_v13 = vld [vmem:[%s2439_s3] ss:$0 sm:$0xff]  ;;  %v1867_v25 = vld [vmem:[%s2408_s6 + $0x18] sm:$0xff]   ;;  %v1868_v26 = vld [vmem:[%s2408_s6 + $0x10] sm:$0xff]  }
  0x23   : > { %1703 = vmatpush3.bf16.msra.mxu0 %v1854_v2  ;;  %v1866_v24 = vld [vmem:[%s2408_s6 + $0x20] sm:$0xff]   ;;  %v1869_v27 = vld [vmem:[%s2408_s6 + $0x8] sm:$0xff]  }
  0x24   : > { %1704 = vmatprep.subr.bf16.mxu0 %v1977_v1  ;;  %v1870_v28 = vld [vmem:[%s2408_s6] sm:$0xff]   ;;  %v1872_v32 = vld [vmem:[%s2409_s7 + $0x8] sm:$0xff]  }
  0x25   : > { %1723 = vmatpush3.bf16.msra.mxu1 %v1862_v12  ;;  %s590_s21 = scalar_lea.vmem %s2440_s30, %s2142_s29  ;;  %v1871_v31 = vld [vmem:[%s2410_s8] sm:$0xff]   ;;  %s594_s30 = scalar_lea.vmem %s2441_s2, %s2142_s29 }
  0x26   : > { %1728 = vmatprep.subr.bf16.mxu1 %v1977_v1  ;;  %v601_v29 = vld [vmem:[%s590_s21] sm:$0xff]  ;;  %s1654_s21 = sshll.u32 %s2093_s28, 7  ;;  %s1416_s2 = scalar_lea.sflag [#allocation3], %s2319_s18 }
  0x27   : > { %1705 = vmatpush3.bf16.msra.mxu0 %v1855_v3  ;;  %v784_v30 = vpack.c.bf16 %v601_v29, %v601_v29  ;;  %v1873_v33 = vld [vmem:[%s2409_s7] sm:$0xff]   ;;  %s2332_s28 = scalar_lea.hbm %s2417_s15, %s1654_s21  ;;  %s2339_s20 = scalar_lea.hbm %s2418_s16, %s1654_s21 }
  0x28   : > { %1706 = vmatprep.subr.bf16.mxu0 %v1977_v1  ;;  %v1612_v34 = vld [vmem:[%s2439_s3 + $0x1] ss:$0 sm:$0xff]  ;;  %v1616_v42 = vld [vmem:[%s2439_s3 + $0x2] ss:$0 sm:$0xff]  ;;  %v1625_v55 = vld [vmem:[%s2439_s3 + $0x3] ss:$0 sm:$0xff] }
  0x29   : > { %v1874_v50 = vld [vmem:[%s2411_s9] sm:$0xff]  }
  0x2a   : > { %v1089_v63 = vld [vmem:[%s2412_s10] sm:$0xf]  ;;  %v1633_v3 = vld [vmem:[%s2439_s3 + $0x4] ss:$0 sm:$0xff] }
  0x2b   : > { %1707 = vmatpush3.bf16.msra.mxu0 %v1856_v4  ;;  %v1103_v0 = vsel %vm1101_vm3, %v1089_v63, 0 }
  0x2c   : > { %1708 = vmatprep.subr.bf16.mxu0 %v1977_v1 }
  0x2f   : > { %1709 = vmatpush3.bf16.msra.mxu0 %v1857_v6 }
  0x30   : > { %1710 = vmatprep.subr.bf16.mxu0 %v1977_v1 }
  0x33   : > { %1711 = vmatpush3.bf16.msra.mxu0 %v1858_v7 }
  0x34   : > { %1712 = vmatprep.subr.bf16.mxu0 %v1977_v1 }
  0x37   : > { %1713 = vmatpush3.bf16.msra.mxu0 %v1859_v8 }
  0x38   : > { %1714 = vmatprep.subr.bf16.mxu0 %v1977_v1 }
  0x3b   : > { %1715 = vmatpush3.bf16.msra.mxu0 %v1860_v9 }
  0x3c   : > { %1748 = vmatprep.subr.bf16.mxu0 %v1977_v1 }
  0x3e   : > { %1717 = vmatmul.mubr.bf16.vlgmr.msra.gmra.mxu0 %v602_v11  ;;  %v1875_v11 = vld [vmem:[%s2413_s11 + $0x8] sm:$0xff]  }
  0x3f   : > { %1752 = vmatprep.mubr.msk.bf16.mxu0 %vm1978_vm0, %v1977_v1  ;;  %1749 = vmatpush3.bf16.msra.mxu0 %v1872_v32  ;;  %v1882_v32 = vld [vmem:[%s2416_s14] sm:$0xff]  }
  0x40   : > { %1750 = vmatprep.subr.bf16.mxu0 %v1977_v1 }
  0x43   : > { %1751 = vmatpush3.bf16.msra.mxu0 %v1873_v33  ;;  %v1636_v33 = vld [vmem:[%s2439_s3 + $0x6] ss:$0 sm:$0xff] }
  0x44   : > { %1756 = vmatprep.subr.bf16.mxu0 %v1977_v1 }
  0xfe   : > { %v708_v14 = vpop.f32.mrf.mxu0 }
  0xff   : > { %v709_v15 = vadd.f32 %v1603_v13, %v708_v14  ;;  %v1078_v13 = vld [vmem:[%s594_s30] sm:$0xff]  ;;  %s1597_s30 = sshll.u32 %s2319_s18, 3 }
 0x100   : > { %v1718_v16 = vpop.f32.mrf.mxu0  ;;  %s569_s19 = scalar_lea.vmem [#allocation2], %s1597_s30 }
 0x101   : > { %v714_v17 = vmax.f32 %v709_v15, 0.0  ;;  %s1438_s0 = sshll.u32 %s569_s19, 4  ;;  %s2334_s0 = int_to_ptr.vmem [resolvable:$true] %s1438_s0 }
 0x102   : > { %v711_v18 = vpop.f32.mrf.mxu0  ;;  %s1885_s4 = scalar_lea.vmem %s2334_s0, 128 }
 0x103   : > { %v715_v20 = vpack.c.bf16 %v714_v17, %v714_v17  ;;  %v1876_v17 = vld [vmem:[%s2415_s13 + $0x8] sm:$0xff]   ;;  %p1886_p11 = scmp.ne.s32.totalorder %s2334_s0, %s1885_s4 }
 0x104   : > { %v1719_v21 = vpop.f32.mrf.mxu0 }
 0x105   : > { %1725 = vmatmul.mubr.msk.bf16.vlgmr.msra.gmra.mxu1 %vm739_vm1, %v715_v20  ;;  %v1878_v20 = vld [vmem:[%s2415_s13] sm:$0xff]   ;;  %p1887_p12 = pnand %p1886_p11, %p2110_p5 }
 0x106   : > { %1729 = vmatpush3.bf16.msra.mxu1 %v1863_v19  ;;  %1744 = vmatprep.mubr.msk.bf16.mxu1 %vm1978_vm0, %v1977_v1  ;;  %v1877_v19 = vld [vmem:[%s2413_s11] sm:$0xff]  }
 0x107   : > { %1730 = vmatprep.subr.bf16.mxu1 %v1977_v1  ;;  %v1634_v21 = vld [vmem:[%s2439_s3 + $0x5] ss:$0 sm:$0xff]  ;;  %p1888_p13 = pneg %p1887_p12 }
 0x10a   : > { %1731 = vmatpush3.bf16.msra.mxu1 %v1864_v22 }
 0x10b   : > { %1732 = vmatprep.subr.bf16.mxu1 %v1977_v1 }
 0x10e   : > { %1733 = vmatpush3.bf16.msra.mxu1 %v1865_v23 }
 0x10f   : > { %1734 = vmatprep.subr.bf16.mxu1 %v1977_v1 }
 0x112   : > { %1735 = vmatpush3.bf16.msra.mxu1 %v1866_v24 }
 0x113   : > { %1736 = vmatprep.subr.bf16.mxu1 %v1977_v1 }
 0x116   : > { %1737 = vmatpush3.bf16.msra.mxu1 %v1867_v25 }
 0x117   : > { %1738 = vmatprep.subr.bf16.mxu1 %v1977_v1 }
 0x11a   : > { %1739 = vmatpush3.bf16.msra.mxu1 %v1868_v26 }
 0x11b   : > { %1740 = vmatprep.subr.bf16.mxu1 %v1977_v1 }
 0x11e   : > { %1741 = vmatpush3.bf16.msra.mxu1 %v1869_v27  ;;  %v1879_v27 = vld [vmem:[%s2414_s12 + $0x8] sm:$0xff]  }
 0x11f   : > { %1742 = vmatprep.subr.bf16.mxu1 %v1977_v1 }
 0x122   : > { %1743 = vmatpush3.bf16.msra.mxu1 %v1870_v28  ;;  %v1880_v28 = vld [vmem:[%s2416_s14 + $0x8] sm:$0xff]  }
 0x123   : > { %1762 = vmatprep.subr.bf16.mxu1 %v1977_v1 }
 0x125   : > { %1745 = vmatmul.mubr.bf16.vlgmr.msra.gmra.mxu1 %v784_v30 }
 0x126   : > { %1764 = vmatprep.mubr.msk.bf16.mxu1 %vm1978_vm0, %v1977_v1  ;;  %1763 = vmatpush3.bf16.msra.mxu1 %v1871_v31  ;;  %v1881_v31 = vld [vmem:[%s2414_s12] sm:$0xff]  }
 0x127   : > { %1774 = vmatprep.subr.bf16.mxu1 %v1977_v1 }
 0x1c5   : > { %v777_v35 = vpop.f32.mrf.mxu1 }
 0x1c6   : > { %v778_v36 = vadd.f32 %v1612_v34, %v777_v35  ;;  %v1640_v34 = vld [vmem:[%s2439_s3 + $0x8] ss:$0 sm:$0xff] }
 0x1c7   : > { %v1726_v37 = vpop.f32.mrf.mxu1 }
 0x1c8   : > { %v783_v38 = vmax.f32 %v778_v36, 0.0 }
 0x1c9   : > { %v780_v39 = vpop.f32.mrf.mxu1 }
 0x1ca   : > { %v965_v40 = vpack.c.bf16 %v783_v38, %v783_v38 }
 0x1cb   : > { %v1727_v41 = vpop.f32.mrf.mxu1 }
 0x1cc   : > { %1765 = vmatmul.mubr.msk.bf16.vlgmr.msra.gmra.mxu1 %vm977_vm2, %v965_v40 }
 0x1cd   : > { %1778 = vmatprep.mubr.msk.bf16.mxu1 %vm1978_vm0, %v1977_v1  ;;  %1775 = vmatpush3.bf16.msra.mxu1 %v1875_v11 }
 0x1ce   : > { %1776 = vmatprep.subr.bf16.mxu1 %v1977_v1 }
 0x1d1   : > { %1777 = vmatpush3.bf16.msra.mxu1 %v1877_v19 }
 0x1d2   : > { %1790 = vmatprep.subr.bf16.mxu1 %v1977_v1 }
 0x1e5   : > { %v890_v43 = vpop.f32.mrf.mxu1 }
 0x1e6   : > { %v891_v44 = vadd.f32 %v1616_v42, %v890_v43 }
 0x1e7   : > { %v1746_v45 = vpop.f32.mrf.mxu1 }
 0x1e8   : > { %v896_v46 = vmax.f32 %v891_v44, 0.0 }
 0x1e9   : > { %v893_v47 = vpop.f32.mrf.mxu1 }
 0x1ea   : > { %v897_v48 = vpack.c.bf16 %v896_v46, %v896_v46 }
 0x1eb   : > { %v1747_v49 = vpop.f32.mrf.mxu1 }
 0x1ec   : > { %1753 = vmatmul.mubr.msk.bf16.vlgmr.msra.gmra.mxu0 %vm739_vm1, %v897_v48  ;;  %v1644_v48 = vld [vmem:[%s2439_s3 + $0x7] ss:$0 sm:$0xff]  ;;  %v1648_v49 = vld [vmem:[%s2439_s3 + $0x9] ss:$0 sm:$0xff] }
 0x1ed   : > { %1758 = vmatprep.mubr.msk.bf16.mxu0 %vm1978_vm0, %v1977_v1  ;;  %1757 = vmatpush3.bf16.msra.mxu0 %v1874_v50 }
 0x1ee   : > { %1768 = vmatprep.subr.bf16.mxu0 %v1977_v1 }
 0x28c   : > { %v1064_v51 = vpop.f32.mrf.mxu1 }
 0x28e   : > { %v1766_v52 = vpop.f32.mrf.mxu1 }
 0x290   : > { %v1067_v53 = vpop.f32.mrf.mxu1 }
 0x292   : > { %v1767_v54 = vpop.f32.mrf.mxu1 }
 0x2ac   : > { %v958_v56 = vpop.f32.mrf.mxu0 }
 0x2ad   : > { %v959_v57 = vadd.f32 %v1625_v55, %v958_v56 }
 0x2ae   : > { %v1754_v58 = vpop.f32.mrf.mxu0 }
 0x2af   : > { %v964_v59 = vmax.f32 %v959_v57, 0.0 }
 0x2b0   : > { %v961_v60 = vpop.f32.mrf.mxu0 }
 0x2b1   : > { %v968_v61 = vpack.c.bf16 %v964_v59, %v964_v59 }
 0x2b2   : > { %v1755_v62 = vpop.f32.mrf.mxu0 }
 0x2b3   : > { %1759 = vmatmul.mubr.msk.bf16.vlgmr.msra.gmra.mxu0 %vm977_vm2, %v968_v61 }
 0x2b4   : > { %1770 = vmatprep.mubr.msk.bf16.mxu0 %vm1978_vm0, %v1977_v1  ;;  %1769 = vmatpush3.bf16.msra.mxu0 %v1103_v0 }
 0x2b5   : > { %1782 = vmatprep.subr.bf16.mxu0 %v1977_v1 }
 0x373   : > { %v1015_v2 = vpop.f32.mrf.mxu0 }
 0x374   : > { %v1065_v4 = vadd.f32 %v1064_v51, %v1015_v2 }
 0x375   : > { %v1760_v5 = vpop.f32.mrf.mxu0 }
 0x376   : > { %v1077_v6 = vadd.f32 %v1633_v3, %v1065_v4 }
 0x377   : > { %v1018_v7 = vpop.f32.mrf.mxu0 }
 0x378   : > { %v1079_v8 = vmul.f32 0.5, %v1077_v6  ;;  %1414 = vst [vmem:[%s598_s26] sm:$0xff] %v1077_v6  ;;  %s1980_s26 = smov [#allocation2]  }
 0x379   : > { %v1761_v9 = vpop.f32.mrf.mxu0  ;;  %s1889_s29 = sshll.u32 %s1980_s26, 4  ;;  %s1890_s29 = int_to_ptr.vmem [resolvable:$false] %s1889_s29 }
 0x37a   : > { %v1080_v10 = vmul.f32 1.442695, %v1079_v8  ;;  %s1891_s3 = scalar_lea.vmem %s1890_s29, 256  ;;  %p1892_p0 = scmp.lt.s32.totalorder %s2334_s0, %s1890_s29 }
 0x37b   : > { %p1893_p1 = scmp.lt.s32.totalorder %s1891_s3, %s1885_s4 }
 0x37c   : > { %1883 = vpow2.f32 %v1080_v10 }
 0x37d   : > { %p1894_p2 = por %p1893_p1, %p1892_p0 }
 0x37f   : > { %p1895_p3 = pnand %p1894_p2, %p1888_p13 }
 0x389   : > { %v1884_v12 = vpop.eup %1883 }
 0x38a   : > { %1083 = vrot.lane.b32.xlu0 %v1884_v12, %s1979_s22  ;;  %s576_s22 = scalar_lea.vmem [#allocation4], %s1597_s30 }
 0x38b   : > { %s1451_s23 = sshll.u32 %s576_s22, 4  ;;  %s2341_s23 = int_to_ptr.vmem [resolvable:$true] %s1451_s23 }
 0x3fc   : > { %v1084_v14 = vpop.permute.xlu0 %1083 }
 0x3fd   : > { %v1086_v15 = vmul.f32 %v1084_v14, %v1078_v13 }
 0x3ff   : > { %v1087_v16 = vadd.f32 %v1086_v15, %v1077_v6 }
 0x401   : > { %v1088_v18 = vpack.c.bf16 %v1087_v16, %v1087_v16 }
 0x403   : > { %1771 = vmatmul.mubr.msk.bf16.vlgmr.msra.gmra.mxu0 %vm1097_vm4, %v1088_v18 }
 0x404   : > { %1783 = vmatpush3.bf16.msra.mxu0 %v1876_v17  ;;  %1786 = vmatprep.mubr.msk.bf16.mxu0 %vm1978_vm0, %v1977_v1 }
 0x405   : > { %1784 = vmatprep.subr.bf16.mxu0 %v1977_v1 }
 0x408   : > { %1785 = vmatpush3.bf16.msra.mxu0 %v1878_v20 }
 0x409   : > { %1798 = vmatprep.subr.bf16.mxu0 %v1977_v1 }
 0x4c3   : > { %v1139_v22 = vpop.f32.mrf.mxu0 }
 0x4c4   : > { %v1140_v23 = vadd.f32 %v1634_v21, %v1139_v22 }
 0x4c5   : > { %v1772_v24 = vpop.f32.mrf.mxu0 }
 0x4c6   : > { %v1145_v25 = vmax.f32 %v1140_v23, 0.0 }
 0x4c7   : > { %v1142_v26 = vpop.f32.mrf.mxu0 }
 0x4c8   : > { %v1146_v29 = vpack.c.bf16 %v1145_v25, %v1145_v25 }
 0x4c9   : > { %v1773_v30 = vpop.f32.mrf.mxu0 }
 0x4ca   : > { %1779 = vmatmul.mubr.msk.bf16.vlgmr.msra.gmra.mxu1 %vm739_vm1, %v1146_v29  ;;  %1787 = vmatmul.mubr.msk.bf16.vlgmr.msra.gmra.mxu0 %vm739_vm1, %v1146_v29 }
 0x4cb   : > { %1791 = vmatpush3.bf16.msra.mxu1 %v1879_v27  ;;  %1799 = vmatpush3.bf16.msra.mxu0 %v1880_v28 }
 0x4cc   : > { %1792 = vmatprep.subr.bf16.mxu1 %v1977_v1  ;;  %1800 = vmatprep.subr.bf16.mxu0 %v1977_v1 }
 0x4cd   : > { %1794 = vmatprep.mubr.msk.bf16.mxu1 %vm1978_vm0, %v1977_v1  ;;  %1802 = vmatprep.mubr.msk.bf16.mxu0 %vm1978_vm0, %v1977_v1 }
 0x4cf   : > { %1793 = vmatpush3.bf16.msra.mxu1 %v1881_v31  ;;  %1801 = vmatpush3.bf16.msra.mxu0 %v1882_v32 }
 0x58a   : > { %v1207_v35 = vpop.f32.mrf.mxu1  ;;  %v1271_v1 = vpop.f32.mrf.mxu0 }
 0x58b   : > { %v1208_v36 = vadd.f32 %v1636_v33, %v1207_v35  ;;  %v1272_v37 = vadd.f32 %v1640_v34, %v1271_v1 }
 0x58c   : > { %v1780_v38 = vpop.f32.mrf.mxu1  ;;  %v1788_v39 = vpop.f32.mrf.mxu0 }
 0x58d   : > { %v1213_v40 = vmax.f32 %v1208_v36, 0.0  ;;  %v1277_v41 = vmax.f32 %v1272_v37, 0.0 }
 0x58e   : > { %v1210_v42 = vpop.f32.mrf.mxu1  ;;  %v1274_v43 = vpop.f32.mrf.mxu0 }
 0x58f   : > { %v1278_v44 = vpack.c.bf16 %v1213_v40, %v1213_v40  ;;  %v1346_v45 = vpack.c.bf16 %v1277_v41, %v1277_v41 }
 0x590   : > { %v1781_v46 = vpop.f32.mrf.mxu1  ;;  %v1789_v47 = vpop.f32.mrf.mxu0 }
 0x591   : > { %1795 = vmatmul.mubr.msk.bf16.vlgmr.msra.gmra.mxu1 %vm739_vm1, %v1278_v44  ;;  %1803 = vmatmul.mubr.msk.bf16.vlgmr.msra.gmra.mxu0 %vm739_vm1, %v1346_v45 }
 0x651   : > { %v1339_v50 = vpop.f32.mrf.mxu1  ;;  %v1407_v51 = vpop.f32.mrf.mxu0 }
 0x652   : > { %v1340_v52 = vadd.f32 %v1644_v48, %v1339_v50  ;;  %v1408_v53 = vadd.f32 %v1648_v49, %v1407_v51 }
 0x653   : > { %v1796_v54 = vpop.f32.mrf.mxu1  ;;  %v1804_v55 = vpop.f32.mrf.mxu0 }
 0x654   : > { %1345 = vst [vmem:[%s569_s19] sm:$0xff] %v1340_v52  ;;  %1413 = vst [vmem:[%s576_s22] sm:$0xff] %v1408_v53 }
 0x655   : > { %v1342_v56 = vpop.f32.mrf.mxu1  ;;  %v1410_v57 = vpop.f32.mrf.mxu0 }
 0x656   : > { %1898 = shalt.err (!%p1895_p3)
}
 0x657   : > { %s1899_s21 = scalar_lea.hbm %s2332_s28, 128  ;;  %s1903_s24 = scalar_lea.hbm %s2417_s15, 256 }
 0x658   : > { %p1900_p4 = scmp.ne.s32.totalorder %s2332_s28, %s1899_s21  ;;  %p1904_p9 = scmp.lt.s32.totalorder %s2332_s28, %s2417_s15 }
 0x659   : > { %p1905_p10 = scmp.lt.s32.totalorder %s1903_s24, %s1899_s21 }
 0x65a   : > { %p1901_p7 = pnand %p1900_p4, %p2110_p5 }
 0x65b   : > { %p1906_p11 = por %p1905_p10, %p1904_p9 }
 0x65c   : > { %p1902_p8 = pneg %p1901_p7 }
 0x65e   : > { %p1907_p12 = pnand %p1906_p11, %p1902_p8 }
 0x660   : > { %1910 = shalt.err (!%p1907_p12)
}
 0x661   : > { %1806 = dma.vmem_to_hbm [thread:$0]  (%p2110_p5), %s2334_s0, 128, %s2332_s28, %s1416_s2  }
 0x662   : > { %s1421_s3 = scalar_lea.sflag [#allocation5], %s2319_s18  ;;  %s1911_s4 = scalar_lea.vmem %s2341_s23, 128 }
 0x663   : > { %p1912_p13 = scmp.ne.s32.totalorder %s2341_s23, %s1911_s4  ;;  %s1981_s29 = smov [#allocation4]  }
 0x664   : > { %s1915_s21 = sshll.u32 %s1981_s29, 4  ;;  %s1916_s21 = int_to_ptr.vmem [resolvable:$false] %s1915_s21 }
 0x665   : > { %p1913_p0 = pnand %p1912_p13, %p2110_p5  ;;  %s1917_s19 = scalar_lea.vmem %s1916_s21, 256 }
 0x666   : > { %p1918_p2 = scmp.lt.s32.totalorder %s2341_s23, %s1916_s21  ;;  %p1919_p3 = scmp.lt.s32.totalorder %s1917_s19, %s1911_s4 }
 0x667   : > { %p1914_p1 = pneg %p1913_p0 }
 0x668   : > { %p1920_p4 = por %p1919_p3, %p1918_p2 }
 0x66a   : > { %p1921_p7 = pnand %p1920_p4, %p1914_p1 }
 0x66c   : > { %1924 = shalt.err (!%p1921_p7)
}
 0x66d   : > { %s1925_s0 = scalar_lea.hbm %s2339_s20, 128  ;;  %s1929_s2 = scalar_lea.hbm %s2418_s16, 256 }
 0x66e   : > { %p1926_p8 = scmp.ne.s32.totalorder %s2339_s20, %s1925_s0  ;;  %p1930_p11 = scmp.lt.s32.totalorder %s2339_s20, %s2418_s16 }
 0x66f   : > { %p1931_p12 = scmp.lt.s32.totalorder %s1929_s2, %s1925_s0 }
 0x670   : > { %p1927_p9 = pnand %p1926_p8, %p2110_p5 }
 0x671   : > { %p1932_p13 = por %p1931_p12, %p1930_p11 }
 0x672   : > { %p1928_p10 = pneg %p1927_p9 }
 0x674   : > { %p1933_p0 = pnand %p1932_p13, %p1928_p10 }
 0x676   : > { %1936 = shalt.err (!%p1933_p0)
}
 0x677   : > { %1807 = dma.vmem_to_hbm [thread:$0]  (%p2110_p5), %s2341_s23, 128, %s2339_s20, %s1421_s3   ;;  %v1797_v58 = vpop.f32.mrf.mxu1  ;;  %v1805_v59 = vpop.f32.mrf.mxu0 }
 0x678 PF: > { %s2442_s30 = sld [smem:[#allocation8_spill]]  ;;  %p1817_p1 = scmp.ge.s32.totalorder %s1975_s27, 2 }
 0x67a   : > { %p1811_p2 = pnand %p1817_p1, %p2114_p6 }
 0x67c   : > { %p1812_p3 = pneg %p1811_p2 }
 0x67e   : > { %s1466_s4 = sand.u32 1, %s2442_s30  }
 0x67f   : > { %s1467_s29 = scalar_lea.sflag [#allocation3], %s1466_s4 }
 0x680   : > { %1954 = dma.done.wait (%p1812_p3), %s1467_s29, 128  }
 0x681   : > { %1956 = vsyncadd (%p1812_p3), %s1467_s29, 4294967168  ;;  %s1476_s21 = scalar_lea.sflag [#allocation5], %s1466_s4 }
 0x682   : > { %1958 = dma.done.wait (%p1812_p3), %s1476_s21, 128  }
 0x683   : > { %1960 = vsyncadd (%p1812_p3), %s1476_s21, 4294967168  ;;  %s2444_s27 = sld [smem:[#allocation10_spill]]  ;;  %s2447_s24 = smov %s1967_s25 }
 0x684   : > { %s2445_s1 = sld [smem:[#allocation9_spill]] }
 0x685   : > { %s2446_s26 = sld [smem:[#allocation11_spill]] }
 0x689   : > { %p31_p5 = scmp.ge.s32.totalorder %s2444_s27, 4  }
 0x68a   : > { %s2448_s25 = smov %s2445_s1 }
 0x68b   :  { %33 = sbr.rel (!%p31_p5) target bundleno = 11 (0xb), region = 150 }
 0x690   :  { %1488 = vsyncpa [#allocation3], 1 }
 0x691   :  { %1490 = vsyncpa [#allocation3 + $0x1], 1 }
 0x692   :  { %1491 = vsyncpa [#allocation5], 1 }
 0x693   :  { %1493 = vsyncpa [#allocation5 + $0x1], 1 }

</bundles_post_ra>
